<compile_context>
chip_gen: v7x
topology: tpu7x:2x2x1
jax: 0.10.0
libtpu: 0.0.40
codegen_flags: <defaults>
</compile_context>

<pallas_src>
import jax
import jax.numpy as jnp
from jax.experimental import pallas as pl
from jax.experimental.pallas import tpu as pltpu


def _round_up(n: int, m: int) -> int:
    return ((n + m - 1) // m) * m


def _cdiv(a: int, b: int) -> int:
    return (a + b - 1) // b


def _vmem_capacity_bytes() -> int:
    try:
        return int(pltpu.get_tpu_info().vmem_capacity_bytes)
    except Exception:
        return 64 << 20  # conservative fallback (v7x per-core VMEM)


def _autoencoder_kernel(x_ref,
                        w1_ref, b1_ref,   # encoder layer 0: input_dim -> 64
                        w2_ref, b2_ref,   # encoder layer 2: 64 -> embedding_dim
                        w3_ref, b3_ref,   # decoder layer 0: embedding_dim -> 64
                        w4_ref, b4_ref,   # decoder layer 2: 64 -> input_dim
                        out_ref, z_ref,
                        h1_ref, h2_ref):
    cdt = w1_ref.dtype                    # MXU input dtype (f32 or bf16)
    x = x_ref[...].astype(cdt)            # x stays f32 in HBM; cast in-kernel

    # encoder: Linear -> ReLU -> Linear (f32 accumulation, f32 bias add)
    h1 = jnp.dot(x, w1_ref[...], preferred_element_type=jnp.float32) + b1_ref[...]
    h1_ref[...] = jnp.maximum(h1, 0.0).astype(cdt)      # fused ReLU + cast
    z = jnp.dot(h1_ref[...], w2_ref[...],
                preferred_element_type=jnp.float32) + b2_ref[...]
    z_ref[...] = z.astype(z_ref.dtype)

    # decoder: Linear -> ReLU -> Linear
    h2 = jnp.dot(z.astype(cdt), w3_ref[...],
                 preferred_element_type=jnp.float32) + b3_ref[...]
    h2_ref[...] = jnp.maximum(h2, 0.0).astype(cdt)
    out = jnp.dot(h2_ref[...], w4_ref[...],
                  preferred_element_type=jnp.float32) + b4_ref[...]
    out_ref[...] = out.astype(out_ref.dtype)


def user_embedding_autoencoder(x, params, *, block_b=2048,
                               compute_dtype=jnp.float32):
    """Full autoencoder forward pass in one batch-tiled Pallas kernel.

    Args:
      x: [B, input_dim] float32.
      params: dict with w1..w4 ([in, out]) and b1..b4 ([1, out]).
      block_b: upper bound on rows per grid step (VMEM budget may lower it).
      compute_dtype: dtype fed to the MXU / written for out & z (f32 or bf16);
        accumulation is always f32.
    Returns:
      (out, z): ([B, input_dim], [B, embedding_dim]) in compute_dtype.
    """
    B, input_dim = x.shape
    hidden = params["w1"].shape[1]
    embedding_dim = params["w2"].shape[1]

    cdtype = jnp.dtype(compute_dtype)
    c_bytes = cdtype.itemsize
    x_bytes = x.dtype.itemsize
    sublane = 16 if c_bytes == 2 else 8   # bf16 packs 16 rows per vreg sublane group

    # ---- batch tile size: VMEM-budget- and padding-aware -------------------
    vmem_cap = _vmem_capacity_bytes()
    # per-row VMEM bytes: double-buffered x/out/z blocks + single scratch h1/h2
    per_row = (2 * input_dim * x_bytes          # x block (f32 input)
               + 2 * input_dim * c_bytes        # out block
               + 2 * embedding_dim * c_bytes    # z block
               + 2 * hidden * c_bytes)          # h1/h2 scratch
    tb_cap = max(sublane, int(0.45 * vmem_cap) // max(per_row, 1))
    tb_cap = min(tb_cap, block_b)

    # >= 2 grid steps when the batch allows it, so ("parallel",) can shard the
    # batch across both v7x TensorCores (one extra ~0.35us step on v5e/v6e).
    min_tiles = 2 if B >= 2 * sublane else 1
    n_tiles = max(_cdiv(B, tb_cap), min_tiles)
    TB = _round_up(_cdiv(B, n_tiles), sublane)   # even split -> minimal padding
    TB = min(TB, _round_up(B, 8))                # never wildly oversize tiny batches
    grid = (_cdiv(B, TB),)

    # Weights cast once to compute_dtype (tiny, VMEM-resident); biases stay f32
    # because they are added after the f32 MXU accumulation (v5e-safe).
    w1 = params["w1"].astype(cdtype); b1 = params["b1"].astype(jnp.float32)
    w2 = params["w2"].astype(cdtype); b2 = params["b2"].astype(jnp.float32)
    w3 = params["w3"].astype(cdtype); b3 = params["b3"].astype(jnp.float32)
    w4 = params["w4"].astype(cdtype); b4 = params["b4"].astype(jnp.float32)

    def resident(a):
        # Constant block index across the batch grid -> stays VMEM-resident
        # (no re-DMA across steps). If lowered VMEM shows these double-buffered,
        # pipeline_mode=pl.Buffered(1) would single-buffer them.
        return pl.BlockSpec(a.shape, lambda i: (0, 0))

    in_specs = [
        pl.BlockSpec((TB, input_dim), lambda i: (i, 0)),   # x: batch-tiled
        resident(w1), resident(b1),
        resident(w2), resident(b2),
        resident(w3), resident(b3),
        resident(w4), resident(b4),
    ]
    out_specs = (
        pl.BlockSpec((TB, input_dim), lambda i: (i, 0)),       # out
        pl.BlockSpec((TB, embedding_dim), lambda i: (i, 0)),   # z
    )

    weight_bytes = 2 * sum(int(a.size) * a.dtype.itemsize
                           for a in (w1, b1, w2, b2, w3, b3, w4, b4))
    needed = TB * per_row + weight_bytes + (4 << 20)            # + margin
    vmem_limit = int(min(0.9 * vmem_cap, max(32 << 20, needed)))

    out, z = pl.pallas_call(
        _autoencoder_kernel,
        out_shape=(
            jax.ShapeDtypeStruct((B, input_dim), cdtype),
            jax.ShapeDtypeStruct((B, embedding_dim), cdtype),
        ),
        grid=grid,
        in_specs=in_specs,
        out_specs=out_specs,
        scratch_shapes=[
            pltpu.VMEM((TB, hidden), cdtype),   # h1 (ReLU output, compute dtype)
            pltpu.VMEM((TB, hidden), cdtype),   # h2
        ],
        compiler_params=pltpu.CompilerParams(
            dimension_semantics=("parallel",),
            vmem_limit_bytes=vmem_limit,
        ),
    )(x, w1, b1, w2, b2, w3, b3, w4, b4)

    return out, z


def init_params(key, input_dim, embedding_dim, hidden=64, dtype=jnp.float32):
    """Deterministic synthetic parameter init (shapes match the nn.Linear layers)."""
    keys = jax.random.split(key, 8)

    def linear(kw, kb, fan_in, fan_out):
        # PyTorch-style uniform(-1/sqrt(fan_in), 1/sqrt(fan_in)); stored [in, out].
        bound = 1.0 / jnp.sqrt(fan_in)
        w = jax.random.uniform(kw, (fan_in, fan_out), dtype, -bound, bound)
        b = jax.random.uniform(kb, (1, fan_out), dtype, -bound, bound)
        return w, b

    w1, b1 = linear(keys[0], keys[1], input_dim, hidden)
    w2, b2 = linear(keys[2], keys[3], hidden, embedding_dim)
    w3, b3 = linear(keys[4], keys[5], embedding_dim, hidden)
    w4, b4 = linear(keys[6], keys[7], hidden, input_dim)
    return dict(w1=w1, b1=b1, w2=w2, b2=b2, w3=w3, b3=b3, w4=w4, b4=b4)


def reference_forward(x, p):
    """Pure-JAX reference of the PyTorch forward, for validation."""
    h1 = jnp.maximum(x @ p["w1"] + p["b1"], 0.0)
    z = h1 @ p["w2"] + p["b2"]
    h2 = jnp.maximum(z @ p["w3"] + p["b3"], 0.0)
    out = h2 @ p["w4"] + p["b4"]
    return out, z


if __name__ == "__main__":
    key = jax.random.PRNGKey(0)
    k_x, k_p, k_x2 = jax.random.split(key, 3)

    batch = 8
    input_dim = 32
    embedding_dim = 16

    x = jax.random.normal(k_x, (batch, input_dim), jnp.float32)
    params = init_params(k_p, input_dim, embedding_dim)
    out_ref, z_ref = reference_forward(x, params)

    # f32 path: matches the PyTorch module numerics.
    out, z = user_embedding_autoencoder(x, params)
    out = jax.block_until_ready(out)
    z = jax.block_until_ready(z)
    assert out.shape == (batch, input_dim)
    assert z.shape == (batch, embedding_dim)
    assert jnp.allclose(out, out_ref, atol=1e-5, rtol=1e-5)
    assert jnp.allclose(z, z_ref, atol=1e-5, rtol=1e-5)

    # bf16 MXU-input / HBM-I/O path (f32 accumulation retained) -> looser tol.
    out_bf, z_bf = user_embedding_autoencoder(x, params, compute_dtype=jnp.bfloat16)
    out_bf = jax.block_until_ready(out_bf).astype(jnp.float32)
    z_bf = jax.block_until_ready(z_bf).astype(jnp.float32)
    assert jnp.allclose(out_bf, out_ref, atol=0.1, rtol=0.1)
    assert jnp.allclose(z_bf, z_ref, atol=0.1, rtol=0.1)

    # Ragged batch: exercises >=2 grid steps (v7x megacore split) and the
    # masked boundary tile (no wrapper padding / slicing anywhere).
    batch2 = 20
    x2 = jax.random.normal(k_x2, (batch2, input_dim), jnp.float32)
    out2_ref, z2_ref = reference_forward(x2, params)
    out2, z2 = user_embedding_autoencoder(x2, params)
    out2 = jax.block_until_ready(out2)
    z2 = jax.block_until_ready(z2)
    assert out2.shape == (batch2, input_dim)
    assert z2.shape == (batch2, embedding_dim)
    assert jnp.allclose(out2, out2_ref, atol=1e-5, rtol=1e-5)
    assert jnp.allclose(z2, z2_ref, atol=1e-5, rtol=1e-5)

    print("KERNEL_OK")
</pallas_src>

<mosaic_0001>
module attributes {stable_mosaic.version = 11 : i64} {
  func.func @_autoencoder_kernel(%arg0: i32, %arg1: memref<8x32xf32, #tpu.memory_space<vmem>>, %arg2: memref<32x64xf32, #tpu.memory_space<vmem>>, %arg3: memref<1x64xf32, #tpu.memory_space<vmem>>, %arg4: memref<64x16xf32, #tpu.memory_space<vmem>>, %arg5: memref<1x16xf32, #tpu.memory_space<vmem>>, %arg6: memref<16x64xf32, #tpu.memory_space<vmem>>, %arg7: memref<1x64xf32, #tpu.memory_space<vmem>>, %arg8: memref<64x32xf32, #tpu.memory_space<vmem>>, %arg9: memref<1x32xf32, #tpu.memory_space<vmem>>, %arg10: memref<8x32xf32, #tpu.memory_space<vmem>>, %arg11: memref<8x16xf32, #tpu.memory_space<vmem>>, %arg12: memref<8x64xf32, #tpu.memory_space<vmem>>, %arg13: memref<8x64xf32, #tpu.memory_space<vmem>>) attributes {dimension_semantics = [#tpu.dimension_semantics<parallel>], iteration_bounds = array<i64: 1>, scalar_prefetch = 0 : i64, scratch_operands = 2 : i64, tpu.core_type = #tpu.core_type<tc>, window_params = [{transform_indices = @transform_0, window_bounds = array<i64: 8, 32>}, {pipeline_mode = #tpu.pipeline_mode<synchronous>, transform_indices = @transform_1, window_bounds = array<i64: 32, 64>}, {pipeline_mode = #tpu.pipeline_mode<synchronous>, transform_indices = @transform_2, window_bounds = array<i64: 1, 64>}, {pipeline_mode = #tpu.pipeline_mode<synchronous>, transform_indices = @transform_3, window_bounds = array<i64: 64, 16>}, {pipeline_mode = #tpu.pipeline_mode<synchronous>, transform_indices = @transform_4, window_bounds = array<i64: 1, 16>}, {pipeline_mode = #tpu.pipeline_mode<synchronous>, transform_indices = @transform_5, window_bounds = array<i64: 16, 64>}, {pipeline_mode = #tpu.pipeline_mode<synchronous>, transform_indices = @transform_6, window_bounds = array<i64: 1, 64>}, {pipeline_mode = #tpu.pipeline_mode<synchronous>, transform_indices = @transform_7, window_bounds = array<i64: 64, 32>}, {pipeline_mode = #tpu.pipeline_mode<synchronous>, transform_indices = @transform_8, window_bounds = array<i64: 1, 32>}, {transform_indices = @transform_9, window_bounds = array<i64: 8, 32>}, {transform_indices = @transform_10, window_bounds = array<i64: 8, 16>}]} {
    %c0 = arith.constant 0 : index
    %c0_0 = arith.constant 0 : index
    %0 = vector.load %arg1[%c0, %c0_0] : memref<8x32xf32, #tpu.memory_space<vmem>>, vector<8x32xf32>
    %c0_1 = arith.constant 0 : index
    %c0_2 = arith.constant 0 : index
    %1 = vector.load %arg2[%c0_1, %c0_2] : memref<32x64xf32, #tpu.memory_space<vmem>>, vector<32x64xf32>
    %cst = arith.constant dense<0.000000e+00> : vector<8x64xf32>
    %2 = tpu.matmul %0, %1, %cst {dimension_numbers = #tpu.dot_dimension_numbers<[1], [0], [0], [1], [0, 0, 1, 1], [], []>} : vector<8x32xf32>, vector<32x64xf32>, vector<8x64xf32> -> vector<8x64xf32>
    %c0_3 = arith.constant 0 : index
    %c0_4 = arith.constant 0 : index
    %3 = vector.load %arg3[%c0_3, %c0_4] : memref<1x64xf32, #tpu.memory_space<vmem>>, vector<1x64xf32>
    %4 = vector.broadcast %3 : vector<1x64xf32> to vector<8x64xf32>
    %5 = arith.addf %2, %4 : vector<8x64xf32>
    %cst_5 = arith.constant 0.000000e+00 : f32
    %6 = vector.broadcast %cst_5 : f32 to vector<8x64xf32>
    %7 = arith.maximumf %5, %6 : vector<8x64xf32>
    %c0_6 = arith.constant 0 : index
    %c0_7 = arith.constant 0 : index
    %8 = vector.load %arg12[%c0_6, %c0_7] : memref<8x64xf32, #tpu.memory_space<vmem>>, vector<8x64xf32>
    tpu.vector_store %arg12[%c0_6, %c0_7], %7 {strides = array<i32>} : memref<8x64xf32, #tpu.memory_space<vmem>>, vector<8x64xf32>,
    %c0_8 = arith.constant 0 : index
    %c0_9 = arith.constant 0 : index
    %9 = vector.load %arg12[%c0_8, %c0_9] : memref<8x64xf32, #tpu.memory_space<vmem>>, vector<8x64xf32>
    %c0_10 = arith.constant 0 : index
    %c0_11 = arith.constant 0 : index
    %10 = vector.load %arg4[%c0_10, %c0_11] : memref<64x16xf32, #tpu.memory_space<vmem>>, vector<64x16xf32>
    %cst_12 = arith.constant dense<0.000000e+00> : vector<8x16xf32>
    %11 = tpu.matmul %9, %10, %cst_12 {dimension_numbers = #tpu.dot_dimension_numbers<[1], [0], [0], [1], [0, 0, 1, 1], [], []>} : vector<8x64xf32>, vector<64x16xf32>, vector<8x16xf32> -> vector<8x16xf32>
    %c0_13 = arith.constant 0 : index
    %c0_14 = arith.constant 0 : index
    %12 = vector.load %arg5[%c0_13, %c0_14] : memref<1x16xf32, #tpu.memory_space<vmem>>, vector<1x16xf32>
    %13 = vector.broadcast %12 : vector<1x16xf32> to vector<8x16xf32>
    %14 = arith.addf %11, %13 : vector<8x16xf32>
    %c0_15 = arith.constant 0 : index
    %c0_16 = arith.constant 0 : index
    %15 = vector.load %arg11[%c0_15, %c0_16] : memref<8x16xf32, #tpu.memory_space<vmem>>, vector<8x16xf32>
    tpu.vector_store %arg11[%c0_15, %c0_16], %14 {strides = array<i32>} : memref<8x16xf32, #tpu.memory_space<vmem>>, vector<8x16xf32>,
    %c0_17 = arith.constant 0 : index
    %c0_18 = arith.constant 0 : index
    %16 = vector.load %arg6[%c0_17, %c0_18] : memref<16x64xf32, #tpu.memory_space<vmem>>, vector<16x64xf32>
    %cst_19 = arith.constant dense<0.000000e+00> : vector<8x64xf32>
    %17 = tpu.matmul %14, %16, %cst_19 {dimension_numbers = #tpu.dot_dimension_numbers<[1], [0], [0], [1], [0, 0, 1, 1], [], []>} : vector<8x16xf32>, vector<16x64xf32>, vector<8x64xf32> -> vector<8x64xf32>
    %c0_20 = arith.constant 0 : index
    %c0_21 = arith.constant 0 : index
    %18 = vector.load %arg7[%c0_20, %c0_21] : memref<1x64xf32, #tpu.memory_space<vmem>>, vector<1x64xf32>
    %19 = vector.broadcast %18 : vector<1x64xf32> to vector<8x64xf32>
    %20 = arith.addf %17, %19 : vector<8x64xf32>
    %cst_22 = arith.constant 0.000000e+00 : f32
    %21 = vector.broadcast %cst_22 : f32 to vector<8x64xf32>
    %22 = arith.maximumf %20, %21 : vector<8x64xf32>
    %c0_23 = arith.constant 0 : index
    %c0_24 = arith.constant 0 : index
    %23 = vector.load %arg13[%c0_23, %c0_24] : memref<8x64xf32, #tpu.memory_space<vmem>>, vector<8x64xf32>
    tpu.vector_store %arg13[%c0_23, %c0_24], %22 {strides = array<i32>} : memref<8x64xf32, #tpu.memory_space<vmem>>, vector<8x64xf32>,
    %c0_25 = arith.constant 0 : index
    %c0_26 = arith.constant 0 : index
    %24 = vector.load %arg13[%c0_25, %c0_26] : memref<8x64xf32, #tpu.memory_space<vmem>>, vector<8x64xf32>
    %c0_27 = arith.constant 0 : index
    %c0_28 = arith.constant 0 : index
    %25 = vector.load %arg8[%c0_27, %c0_28] : memref<64x32xf32, #tpu.memory_space<vmem>>, vector<64x32xf32>
    %cst_29 = arith.constant dense<0.000000e+00> : vector<8x32xf32>
    %26 = tpu.matmul %24, %25, %cst_29 {dimension_numbers = #tpu.dot_dimension_numbers<[1], [0], [0], [1], [0, 0, 1, 1], [], []>} : vector<8x64xf32>, vector<64x32xf32>, vector<8x32xf32> -> vector<8x32xf32>
    %c0_30 = arith.constant 0 : index
    %c0_31 = arith.constant 0 : index
    %27 = vector.load %arg9[%c0_30, %c0_31] : memref<1x32xf32, #tpu.memory_space<vmem>>, vector<1x32xf32>
    %28 = vector.broadcast %27 : vector<1x32xf32> to vector<8x32xf32>
    %29 = arith.addf %26, %28 : vector<8x32xf32>
    %c0_32 = arith.constant 0 : index
    %c0_33 = arith.constant 0 : index
    %30 = vector.load %arg10[%c0_32, %c0_33] : memref<8x32xf32, #tpu.memory_space<vmem>>, vector<8x32xf32>
    tpu.vector_store %arg10[%c0_32, %c0_33], %29 {strides = array<i32>} : memref<8x32xf32, #tpu.memory_space<vmem>>, vector<8x32xf32>,
    return
  }
  func.func @transform_0(%arg0: i32) -> (i32, i32) {
    %c0_i32 = arith.constant 0 : i32
    %c0_i32_0 = arith.constant 0 : i32
    return %arg0, %c0_i32 : i32, i32
  }
  func.func @transform_1(%arg0: i32) -> (i32, i32) {
    %c0_i32 = arith.constant 0 : i32
    %c0_i32_0 = arith.constant 0 : i32
    %c0_i32_1 = arith.constant 0 : i32
    return %c0_i32, %c0_i32_0 : i32, i32
  }
  func.func @transform_2(%arg0: i32) -> (i32, i32) {
    %c0_i32 = arith.constant 0 : i32
    %c0_i32_0 = arith.constant 0 : i32
    %c0_i32_1 = arith.constant 0 : i32
    return %c0_i32, %c0_i32_0 : i32, i32
  }
  func.func @transform_3(%arg0: i32) -> (i32, i32) {
    %c0_i32 = arith.constant 0 : i32
    %c0_i32_0 = arith.constant 0 : i32
    %c0_i32_1 = arith.constant 0 : i32
    return %c0_i32, %c0_i32_0 : i32, i32
  }
  func.func @transform_4(%arg0: i32) -> (i32, i32) {
    %c0_i32 = arith.constant 0 : i32
    %c0_i32_0 = arith.constant 0 : i32
    %c0_i32_1 = arith.constant 0 : i32
    return %c0_i32, %c0_i32_0 : i32, i32
  }
  func.func @transform_5(%arg0: i32) -> (i32, i32) {
    %c0_i32 = arith.constant 0 : i32
    %c0_i32_0 = arith.constant 0 : i32
    %c0_i32_1 = arith.constant 0 : i32
    return %c0_i32, %c0_i32_0 : i32, i32
  }
  func.func @transform_6(%arg0: i32) -> (i32, i32) {
    %c0_i32 = arith.constant 0 : i32
    %c0_i32_0 = arith.constant 0 : i32
    %c0_i32_1 = arith.constant 0 : i32
    return %c0_i32, %c0_i32_0 : i32, i32
  }
  func.func @transform_7(%arg0: i32) -> (i32, i32) {
    %c0_i32 = arith.constant 0 : i32
    %c0_i32_0 = arith.constant 0 : i32
    %c0_i32_1 = arith.constant 0 : i32
    return %c0_i32, %c0_i32_0 : i32, i32
  }
  func.func @transform_8(%arg0: i32) -> (i32, i32) {
    %c0_i32 = arith.constant 0 : i32
    %c0_i32_0 = arith.constant 0 : i32
    %c0_i32_1 = arith.constant 0 : i32
    return %c0_i32, %c0_i32_0 : i32, i32
  }
  func.func @transform_9(%arg0: i32) -> (i32, i32) {
    %c0_i32 = arith.constant 0 : i32
    %c0_i32_0 = arith.constant 0 : i32
    return %arg0, %c0_i32 : i32, i32
  }
  func.func @transform_10(%arg0: i32) -> (i32, i32) {
    %c0_i32 = arith.constant 0 : i32
    %c0_i32_0 = arith.constant 0 : i32
    return %arg0, %c0_i32 : i32, i32
  }
}

</mosaic_0001>

<bundles_post_ra>
// kernel: tpu_custom_call.1
= control target key start
LH: loop header
LB: loop body
LE: loop exit
PB: predicated region body
PF: predicated region fallthrough
CT: control target
= control target key end

     0   :  { %16 = vsyncpa [#allocation5], 0  ;;  %v594_v3 = vmov 0.0|0.0   ;;  %vm595_vm0 = vmmov 0   ;;  %v596_v6 = vmov 0.0   ;;  %s780_s0 = inlined_call_operand.vmem [shape: f32[8,32], index: 0, kind: input, shape index: {}]   ;;  %s781_s1 = inlined_call_operand.vmem [shape: f32[32,64], index: 1, kind: input, shape index: {}]   ;;  %s782_s2 = inlined_call_operand.vmem [shape: f32[1,64], index: 2, kind: input, shape index: {}]   ;;  %s783_s3 = inlined_call_operand.vmem [shape: f32[64,16], index: 3, kind: input, shape index: {}]   ;;  %s784_s4 = inlined_call_operand.vmem [shape: f32[1,16], index: 4, kind: input, shape index: {}]   ;;  %s785_s5 = inlined_call_operand.vmem [shape: f32[16,64], index: 5, kind: input, shape index: {}]   ;;  %s786_s6 = inlined_call_operand.vmem [shape: f32[1,64], index: 6, kind: input, shape index: {}]   ;;  %s787_s7 = inlined_call_operand.vmem [shape: f32[64,32], index: 7, kind: input, shape index: {}]   ;;  %s788_s8 = inlined_call_operand.vmem [shape: f32[1,32], index: 8, kind: input, shape index: {}]   ;;  %s789_s9 = inlined_call_operand.hbm [shape: f32[8,32], index: 9, kind: output, shape index: {0}]   ;;  %s790_s10 = inlined_call_operand.hbm [shape: f32[8,16], index: 10, kind: output, shape index: {1}]  }
   0x1   :  { %v37_v0 = vld [vmem:[%s781_s1] sm:$0xff]  ;;  %v38_v1 = vld [vmem:[%s781_s1 + $0x8] sm:$0xff]  ;;  %v39_v2 = vld [vmem:[%s781_s1 + $0x10] sm:$0xff]  ;;  %508 = vmatprep.subr.bf16.mxu1 %v594_v3  ;;  %460 = vmatprep.mubr.msk.f32.mxu1 %vm595_vm0, %v596_v6 }
   0x2   :  { %v509_v4 = vpack.c.bf16 %v38_v1, %v37_v0  ;;  %v40_v5 = vld [vmem:[%s781_s1 + $0x18] sm:$0xff]  ;;  %526 = vmatprep.subr.bf16.mxu0 %v594_v3  ;;  %486 = vmatprep.mubr.msk.f32.mxu0 %vm595_vm0, %v596_v6 }
   0x3   :  { %17 = vsyncpa [#allocation7], 0  ;;  %v512_v7 = vpack.c.bf16 %v40_v5, %v39_v2  ;;  %v126_v8 = vld [vmem:[%s783_s3] sm:$0xff]  ;;  %v127_v9 = vld [vmem:[%s783_s3 + $0x8] sm:$0xff]  ;;  %vm48_vm1 = vcmask 261120   ;;  %vm123_vm2 = vcmask 523264  }
   0x4   :  { %510 = vmatpush3.bf16.msra.mxu1 %v509_v4  ;;  %v36_v10 = vld [vmem:[%s780_s0] sm:$0xff]  ;;  %v515_v11 = vpack.c.bf16 %v127_v9, %v126_v8  ;;  %v128_v12 = vld [vmem:[%s783_s3 + $0x10] sm:$0xff]  ;;  %v129_v13 = vld [vmem:[%s783_s3 + $0x18] sm:$0xff]  ;;  %vm214_vm3 = vcmask 130048   ;;  %s597_s17 = smov [#allocation6]  }
   0x5   :  { %511 = vmatprep.subr.bf16.mxu1 %v594_v3  ;;  %v518_v14 = vpack.c.bf16 %v129_v13, %v128_v12  ;;  %v130_v15 = vld [vmem:[%s783_s3 + $0x20] sm:$0xff]  ;;  %v131_v16 = vld [vmem:[%s783_s3 + $0x28] sm:$0xff]  ;;  %v132_v18 = vld [vmem:[%s783_s3 + $0x30] sm:$0xff] }
   0x6   :  { %v521_v17 = vpack.c.bf16 %v131_v16, %v130_v15  ;;  %v133_v19 = vld [vmem:[%s783_s3 + $0x38] sm:$0xff]  ;;  %v418_v21 = vld [vmem:[%s782_s2] ss:$0 sm:$0xff]  ;;  %v217_v28 = vld [vmem:[%s785_s5 + $0x8] sm:$0xff] }
   0x7   :  { %v524_v20 = vpack.c.bf16 %v133_v19, %v132_v18  ;;  %v216_v27 = vld [vmem:[%s785_s5] sm:$0xff]  ;;  %v302_v31 = vld [vmem:[%s787_s7 + $0x8] sm:$0xff]  ;;  %v303_v37 = vld [vmem:[%s787_s7 + $0x10] sm:$0xff] }
   0x8   :  { %513 = vmatpush3.bf16.msra.mxu1 %v512_v7  ;;  %v527_v29 = vpack.c.bf16 %v217_v28, %v216_v27  ;;  %v301_v30 = vld [vmem:[%s787_s7] sm:$0xff]  ;;  %v304_v38 = vld [vmem:[%s787_s7 + $0x18] sm:$0xff]  ;;  %v306_v41 = vld [vmem:[%s787_s7 + $0x28] sm:$0xff] }
   0x9   :  { %514 = vmatprep.subr.bf16.mxu1 %v594_v3  ;;  %v420_v32 = vld [vmem:[%s784_s4] ss:$0 sm:$0xff]  ;;  %v530_v34 = vpack.c.bf16 %v302_v31, %v301_v30  ;;  %v533_v39 = vpack.c.bf16 %v304_v38, %v303_v37  ;;  %v307_v43 = vld [vmem:[%s787_s7 + $0x30] sm:$0xff]  ;;  %v308_v44 = vld [vmem:[%s787_s7 + $0x38] sm:$0xff] }
   0xa   :  { %528 = vmatpush3.bf16.msra.mxu0 %v527_v29  ;;  %v305_v40 = vld [vmem:[%s787_s7 + $0x20] sm:$0xff]  ;;  %v539_v45 = vpack.c.bf16 %v308_v44, %v307_v43  ;;  %s406_s7 = sshll.u32 %s597_s17, 4  ;;  %s407_s7 = int_to_ptr.vmem [resolvable:$true] %s406_s7 }
   0xb   :  { %461 = vmatmul.mubr.msk.f32.vlgmr.msra.gmra.mrb[0].mxu1 %vm48_vm1, %v36_v10  ;;  %529 = vmatprep.subr.bf16.mxu0 %v594_v3  ;;  %v536_v42 = vpack.c.bf16 %v306_v41, %v305_v40  ;;  %v422_v46 = vld [vmem:[%s786_s6] ss:$0 sm:$0xff]  ;;  %s546_s18 = scalar_lea.vmem %s407_s7, 128  ;;  %p551_p1 = scmp.lt.s32.totalorder %s407_s7, %s407_s7 }
   0xc   :  { %516 = vmatpush3.bf16.msra.mxu1 %v515_v11  ;;  %479 = vmatprep.mubr.msk.f32.mxu1 %vm595_vm0, %v596_v6  ;;  %p547_p0 = scmp.ne.s32.totalorder %s407_s7, %s546_s18  ;;  %p552_p2 = scmp.lt.s32.totalorder %s546_s18, %s546_s18 }
   0xd   :  { %517 = vmatprep.subr.bf16.mxu1 %v594_v3 }
   0xe   :  { %p553_p3 = por %p552_p2, %p551_p1 }
  0x10   :  { %519 = vmatpush3.bf16.msra.mxu1 %v518_v14  ;;  %p554_p4 = pnand %p553_p3, %p547_p0 }
  0x11   :  { %520 = vmatprep.subr.bf16.mxu1 %v594_v3 }
  0x14   :  { %522 = vmatpush3.bf16.msra.mxu1 %v521_v17 }
  0x15   :  { %523 = vmatprep.subr.bf16.mxu1 %v594_v3 }
  0x18   :  { %525 = vmatpush3.bf16.msra.mxu1 %v524_v20 }
  0xde   :  { %v118_v22 = vpop.f32.mrb[0].mxu1 }
  0xdf   :  { %v119_v23 = vadd.f32 %v418_v21, %v118_v22  ;;  %v462_v24 = vpop.f32.mrb[1].mxu1 }
  0xe1   :  { %v122_v25 = vmax.f32 %v119_v23, 0.0 }
  0xe3   :  { %124 = vst.msk [vmem:[#allocation2] sm:$0xff] %vm123_vm2, %v122_v25 }
  0xea   :  { %v125_v26 = vld [vmem:[#allocation2] sm:$0xff] }
  0xeb   :  { %480 = vmatmul.mubr.msk.f32.vlgmr.msra.gmra.mrb[2].mxu1 %vm123_vm2, %v125_v26 }
 0x1be   :  { %v210_v33 = vpop.f32.mrb[2].mxu1 }
 0x1bf   :  { %v211_v35 = vadd.f32 %v420_v32, %v210_v33  ;;  %v481_v36 = vpop.f32.mrb[3].mxu1 }
 0x1c1   :  { %487 = vmatmul.mubr.msk.f32.vlgmr.msra.gmra.mrb[0].mxu0 %vm214_vm3, %v211_v35  ;;  %215 = vst.msk [vmem:[#allocation6] sm:$0xff] %vm214_vm3, %v211_v35 }
 0x1c2   :  { %531 = vmatpush3.bf16.msra.mxu0 %v530_v34  ;;  %505 = vmatprep.mubr.msk.f32.mxu0 %vm595_vm0, %v596_v6 }
 0x1c3   :  { %532 = vmatprep.subr.bf16.mxu0 %v594_v3 }
 0x1c6   :  { %534 = vmatpush3.bf16.msra.mxu0 %v533_v39 }
 0x1c7   :  { %535 = vmatprep.subr.bf16.mxu0 %v594_v3 }
 0x1ca   :  { %537 = vmatpush3.bf16.msra.mxu0 %v536_v42 }
 0x1cb   :  { %538 = vmatprep.subr.bf16.mxu0 %v594_v3 }
 0x1ce   :  { %540 = vmatpush3.bf16.msra.mxu0 %v539_v45 }
 0x294   :  { %v294_v47 = vpop.f32.mrb[0].mxu0 }
 0x295   :  { %v295_v48 = vadd.f32 %v422_v46, %v294_v47  ;;  %v488_v49 = vpop.f32.mrb[1].mxu0 }
 0x297   :  { %v298_v50 = vmax.f32 %v295_v48, 0.0 }
 0x299   :  { %299 = vst.msk [vmem:[#allocation3] sm:$0xff] %vm123_vm2, %v298_v50 }
 0x2a0   :  { %v300_v51 = vld [vmem:[#allocation3] sm:$0xff] }
 0x2a1   :  { %506 = vmatmul.mubr.msk.f32.vlgmr.msra.gmra.mrb[2].mxu0 %vm123_vm2, %v300_v51 }
 0x2a2   :  { %557 = shalt.err (!%p554_p4)
}
 0x2a3   :  { %s558_s19 = scalar_lea.hbm %s790_s10, 128 }
 0x2a4   :  { %p559_p5 = scmp.ne.s32.totalorder %s790_s10, %s558_s19  ;;  %p562_p6 = scmp.lt.u32.totalorder %s558_s19, %s790_s10 }
 0x2a6   :  { %p564_p7 = pnand %p562_p6, %p559_p5 }
 0x2a8   :  { %567 = shalt.err (!%p564_p7)
}
 0x2a9   :  { %409 = dma.vmem_to_hbm [thread:$0]  %s407_s7, 128, %s790_s10, [#allocation7]   ;;  %v424_v52 = vld [vmem:[%s788_s8] ss:$0 sm:$0xff] }
 0x2aa   :  { %s598_s5 = smov [#allocation4]  }
 0x2ab   :  { %s396_s26 = sshll.u32 %s598_s5, 4  ;;  %s397_s26 = int_to_ptr.vmem [resolvable:$true] %s396_s26 }
 0x2ac   :  { %s568_s27 = scalar_lea.vmem %s397_s26, 128  ;;  %p573_p9 = scmp.lt.s32.totalorder %s397_s26, %s397_s26 }
 0x2ad   :  { %p569_p8 = scmp.ne.s32.totalorder %s397_s26, %s568_s27  ;;  %p574_p10 = scmp.lt.s32.totalorder %s568_s27, %s568_s27 }
 0x2af   :  { %p575_p11 = por %p574_p10, %p573_p9 }
 0x2b1   :  { %p576_p12 = pnand %p575_p11, %p569_p8 }
 0x374   :  { %v385_v53 = vpop.f32.mrb[2].mxu0 }
 0x375   :  { %v386_v54 = vadd.f32 %v424_v52, %v385_v53  ;;  %v507_v55 = vpop.f32.mrb[3].mxu0 }
 0x377   :  { %389 = vst.msk [vmem:[#allocation4] sm:$0xff] %vm48_vm1, %v386_v54 }
 0x378   :  { %579 = shalt.err (!%p576_p12)
}
 0x379   :  { %s580_s4 = scalar_lea.hbm %s789_s9, 128 }
 0x37a   :  { %p581_p13 = scmp.ne.s32.totalorder %s789_s9, %s580_s4  ;;  %p584_p0 = scmp.lt.u32.totalorder %s580_s4, %s789_s9 }
 0x37c   :  { %p586_p1 = pnand %p584_p0, %p581_p13 }
 0x37e   :  { %589 = shalt.err (!%p586_p1)
}
 0x37f   :  { %399 = dma.vmem_to_hbm [thread:$0]  %s397_s26, 128, %s789_s9, [#allocation5]  }
 0x380   :  { %590 = dma.done.wait [#allocation5], 128  }
 0x381   :  { %591 = vsyncadd [#allocation5], 4294967168 }
 0x382   :  { %592 = dma.done.wait [#allocation7], 128  }
 0x383   :  { %593 = vsyncadd [#allocation7], 4294967168 }
 0x384   :  { %416 = vsyncpa [#allocation5], 1 }
 0x385   :  { %417 = vsyncpa [#allocation7], 1 }

</bundles_post_ra>
